<compile_context>
chip_gen: v5e
topology: v5e:2x2
jax: 0.10.0
libtpu: 0.0.40
codegen_flags: <defaults>
</compile_context>

<pallas_src>
import jax
import jax.numpy as jnp
from jax.experimental import pallas as pl
from jax.experimental.pallas import tpu as pltpu


LANE = 128   # TPU lane width
TN = 128     # node-row tile
TE = 128     # edge-row tile


def _round_up(x, m):
    return (x + m - 1) // m * m


# ---------------------------------------------------------------------------
# Kernel A: node projections  Pu = h @ Wu + b,   Pv = h @ Wv
# (reassociation of the concatenated Linear)
# ---------------------------------------------------------------------------
def node_proj_kernel(h_ref, wu_ref, wv_ref, b_ref, pu_ref, pv_ref):
    h = h_ref[...]
    pu_ref[...] = (jnp.dot(h, wu_ref[...], preferred_element_type=jnp.float32)
                   + b_ref[...])
    pv_ref[...] = jnp.dot(h, wv_ref[...], preferred_element_type=jnp.float32)


# ---------------------------------------------------------------------------
# Kernel B: per-edge scoring with the node gather done inside the kernel.
# score[e] = Pu[src[e]] + Pv[dst[e]]  -- gather expressed as an on-the-fly
# one-hot matmul built from broadcasted_iota == src/dst (no HBM adjacency,
# no (E, F) gathered intermediates).
# ---------------------------------------------------------------------------
def edge_score_kernel(src_ref, dst_ref, pu_ref, pv_ref, out_ref):
    te = src_ref.shape[0]
    n_pad = pu_ref.shape[0]
    node_ids = jax.lax.broadcasted_iota(jnp.int32, (te, n_pad), 1)
    oh_src = (node_ids == src_ref[...]).astype(jnp.float32)   # (TE, N_pad)
    oh_dst = (node_ids == dst_ref[...]).astype(jnp.float32)
    score = (jnp.dot(oh_src, pu_ref[...], preferred_element_type=jnp.float32)
             + jnp.dot(oh_dst, pv_ref[...], preferred_element_type=jnp.float32))
    out_ref[...] = score


def mlp_predictor_forward(h, src, dst, w, b, *, compute_dtype=jnp.float32):
    """MLPPredictor.forward.

    h   : (N, F)    float32 node features
    src : (E,)      int     edge source node ids
    dst : (E,)      int     edge destination node ids
    w   : (C, 2F)   float32 nn.Linear weight (PyTorch layout)
    b   : (C,)      float32 nn.Linear bias
    returns (E, C)  float32 edge scores
    """
    n, f = h.shape
    e = src.shape[0]
    c = w.shape[0]

    n_pad = _round_up(n, TN)
    e_pad = _round_up(e, TE)
    c_pad = _round_up(c, LANE)

    # Split the concatenated weight, transpose to (F, C), and pad the class
    # dim up to a full 128-lane width so every store / DMA row is lane-dense.
    wu = jnp.zeros((f, c_pad), jnp.float32).at[:, :c].set(w[:, :f].T)
    wv = jnp.zeros((f, c_pad), jnp.float32).at[:, :c].set(w[:, f:].T)
    bp = jnp.zeros((1, c_pad), jnp.float32).at[0, :c].set(b)

    h_pad = jnp.zeros((n_pad, f), jnp.float32).at[:n].set(h)

    # Cast matmul operands to the compute dtype (bf16 recommended on v6e/v7x);
    # bias, gather and accumulation stay f32.
    h_c = h_pad.astype(compute_dtype)
    wu_c = wu.astype(compute_dtype)
    wv_c = wv.astype(compute_dtype)

    itemsize = jnp.dtype(compute_dtype).itemsize
    cparams = pltpu.CompilerParams(
        dimension_semantics=("parallel",),
        vmem_limit_bytes=32 * 1024 * 1024)

    # ---- Kernel A: node projections (grid over node-row tiles) -------------
    proj_cost = pl.CostEstimate(
        flops=2 * 2 * n_pad * f * c_pad,
        transcendentals=0,
        bytes_accessed=(n_pad * f * itemsize
                        + 2 * f * c_pad * itemsize
                        + c_pad * 4
                        + 2 * n_pad * c_pad * 4))
    pu, pv = pl.pallas_call(
        node_proj_kernel,
        out_shape=(jax.ShapeDtypeStruct((n_pad, c_pad), jnp.float32),
                   jax.ShapeDtypeStruct((n_pad, c_pad), jnp.float32)),
        grid=(n_pad // TN,),
        in_specs=[pl.BlockSpec((TN, f), lambda i: (i, 0)),
                  pl.BlockSpec((f, c_pad), lambda i: (0, 0)),
                  pl.BlockSpec((f, c_pad), lambda i: (0, 0)),
                  pl.BlockSpec((1, c_pad), lambda i: (0, 0))],
        out_specs=(pl.BlockSpec((TN, c_pad), lambda i: (i, 0)),
                   pl.BlockSpec((TN, c_pad), lambda i: (i, 0))),
        compiler_params=cparams,
        cost_estimate=proj_cost,
    )(h_c, wu_c, wv_c, bp)

    # ---- Kernel B: edge scoring with in-kernel gather (grid over edge tiles)
    src_p = jnp.zeros((e_pad, 1), jnp.int32).at[:e, 0].set(src.astype(jnp.int32))
    dst_p = jnp.zeros((e_pad, 1), jnp.int32).at[:e, 0].set(dst.astype(jnp.int32))

    edge_cost = pl.CostEstimate(
        flops=2 * 2 * e_pad * n_pad * c_pad,
        transcendentals=0,
        bytes_accessed=(2 * e_pad * 4
                        + 2 * n_pad * c_pad * 4
                        + e_pad * c_pad * 4))
    # TODO(synk): for very large N the whole (N_pad, C_pad) projection table
    # no longer fits VMEM; tile N as a reduction axis or switch to a manual
    # DMA row-gather instead of the one-hot matmul.
    score = pl.pallas_call(
        edge_score_kernel,
        out_shape=jax.ShapeDtypeStruct((e_pad, c_pad), jnp.float32),
        grid=(e_pad // TE,),
        in_specs=[pl.BlockSpec((TE, 1), lambda i: (i, 0)),
                  pl.BlockSpec((TE, 1), lambda i: (i, 0)),
                  pl.BlockSpec((n_pad, c_pad), lambda i: (0, 0)),
                  pl.BlockSpec((n_pad, c_pad), lambda i: (0, 0))],
        out_specs=pl.BlockSpec((TE, c_pad), lambda i: (i, 0)),
        compiler_params=cparams,
        cost_estimate=edge_cost,
    )(src_p, dst_p, pu, pv)

    return score[:e, :c]


if __name__ == "__main__":
    key = jax.random.PRNGKey(0)
    k_h, k_src, k_dst, k_w, k_b = jax.random.split(key, 5)

    N, E = 64, 200          # nodes, edges (E deliberately not a tile multiple)
    F, C = 128, 2           # in_features, out_classes

    h = jax.random.normal(k_h, (N, F), jnp.float32)
    src = jax.random.randint(k_src, (E,), 0, N, dtype=jnp.int32)
    dst = jax.random.randint(k_dst, (E,), 0, N, dtype=jnp.int32)

    # PyTorch nn.Linear(2F, C) default init: U(-1/sqrt(2F), 1/sqrt(2F)).
    k_lin = 1.0 / jnp.sqrt(jnp.float32(2 * F))
    w = jax.random.uniform(k_w, (C, 2 * F), jnp.float32, -k_lin, k_lin)
    b = jax.random.uniform(k_b, (C,), jnp.float32, -k_lin, k_lin)

    score = jax.block_until_ready(mlp_predictor_forward(h, src, dst, w, b))
    assert score.shape == (E, C)

    # Pure-JAX reference: gather -> concat -> linear (matches the PyTorch module).
    ref = jnp.concatenate([h[src], h[dst]], axis=1) @ w.T + b
    assert jnp.allclose(score, ref, atol=1e-3, rtol=1e-3), "f32 mismatch vs reference"

    # bf16 operand path (MXU-native on v6e/v7x); gather/accumulation stay f32.
    score_bf16 = jax.block_until_ready(
        mlp_predictor_forward(h, src, dst, w, b, compute_dtype=jnp.bfloat16))
    assert jnp.allclose(score_bf16, ref, atol=5e-2, rtol=5e-2), "bf16 mismatch vs reference"

    print("KERNEL_OK")
</pallas_src>

<mosaic_0001>
module attributes {stable_mosaic.version = 11 : i64} {
  func.func @node_proj_kernel(%arg0: i32, %arg1: memref<128x128xf32, #tpu.memory_space<vmem>>, %arg2: memref<128x128xf32, #tpu.memory_space<vmem>>, %arg3: memref<128x128xf32, #tpu.memory_space<vmem>>, %arg4: memref<1x128xf32, #tpu.memory_space<vmem>>, %arg5: memref<128x128xf32, #tpu.memory_space<vmem>>, %arg6: memref<128x128xf32, #tpu.memory_space<vmem>>) attributes {dimension_semantics = [#tpu.dimension_semantics<parallel>], iteration_bounds = array<i64: 1>, scalar_prefetch = 0 : i64, scratch_operands = 0 : i64, tpu.core_type = #tpu.core_type<tc>, window_params = [{transform_indices = @transform_0, window_bounds = array<i64: 128, 128>}, {pipeline_mode = #tpu.pipeline_mode<synchronous>, transform_indices = @transform_1, window_bounds = array<i64: 128, 128>}, {pipeline_mode = #tpu.pipeline_mode<synchronous>, transform_indices = @transform_2, window_bounds = array<i64: 128, 128>}, {pipeline_mode = #tpu.pipeline_mode<synchronous>, transform_indices = @transform_3, window_bounds = array<i64: 1, 128>}, {transform_indices = @transform_4, window_bounds = array<i64: 128, 128>}, {transform_indices = @transform_5, window_bounds = array<i64: 128, 128>}]} {
    %c0 = arith.constant 0 : index
    %c0_0 = arith.constant 0 : index
    %0 = vector.load %arg1[%c0, %c0_0] : memref<128x128xf32, #tpu.memory_space<vmem>>, vector<128x128xf32>
    %c0_1 = arith.constant 0 : index
    %c0_2 = arith.constant 0 : index
    %1 = vector.load %arg2[%c0_1, %c0_2] : memref<128x128xf32, #tpu.memory_space<vmem>>, vector<128x128xf32>
    %cst = arith.constant dense<0.000000e+00> : vector<128x128xf32>
    %2 = tpu.matmul %0, %1, %cst {dimension_numbers = #tpu.dot_dimension_numbers<[1], [0], [0], [1], [0, 0, 1, 1], [], []>} : vector<128x128xf32>, vector<128x128xf32>, vector<128x128xf32> -> vector<128x128xf32>
    %c0_3 = arith.constant 0 : index
    %c0_4 = arith.constant 0 : index
    %3 = vector.load %arg4[%c0_3, %c0_4] : memref<1x128xf32, #tpu.memory_space<vmem>>, vector<1x128xf32>
    %4 = vector.broadcast %3 : vector<1x128xf32> to vector<128x128xf32>
    %5 = arith.addf %2, %4 : vector<128x128xf32>
    %c0_5 = arith.constant 0 : index
    %c0_6 = arith.constant 0 : index
    %6 = vector.load %arg5[%c0_5, %c0_6] : memref<128x128xf32, #tpu.memory_space<vmem>>, vector<128x128xf32>
    tpu.vector_store %arg5[%c0_5, %c0_6], %5 {strides = array<i32>} : memref<128x128xf32, #tpu.memory_space<vmem>>, vector<128x128xf32>,
    %c0_7 = arith.constant 0 : index
    %c0_8 = arith.constant 0 : index
    %7 = vector.load %arg3[%c0_7, %c0_8] : memref<128x128xf32, #tpu.memory_space<vmem>>, vector<128x128xf32>
    %cst_9 = arith.constant dense<0.000000e+00> : vector<128x128xf32>
    %8 = tpu.matmul %0, %7, %cst_9 {dimension_numbers = #tpu.dot_dimension_numbers<[1], [0], [0], [1], [0, 0, 1, 1], [], []>} : vector<128x128xf32>, vector<128x128xf32>, vector<128x128xf32> -> vector<128x128xf32>
    %c0_10 = arith.constant 0 : index
    %c0_11 = arith.constant 0 : index
    %9 = vector.load %arg6[%c0_10, %c0_11] : memref<128x128xf32, #tpu.memory_space<vmem>>, vector<128x128xf32>
    tpu.vector_store %arg6[%c0_10, %c0_11], %8 {strides = array<i32>} : memref<128x128xf32, #tpu.memory_space<vmem>>, vector<128x128xf32>,
    return
  }
  func.func @transform_0(%arg0: i32) -> (i32, i32) {
    %c0_i32 = arith.constant 0 : i32
    %c0_i32_0 = arith.constant 0 : i32
    return %arg0, %c0_i32 : i32, i32
  }
  func.func @transform_1(%arg0: i32) -> (i32, i32) {
    %c0_i32 = arith.constant 0 : i32
    %c0_i32_0 = arith.constant 0 : i32
    %c0_i32_1 = arith.constant 0 : i32
    return %c0_i32, %c0_i32_0 : i32, i32
  }
  func.func @transform_2(%arg0: i32) -> (i32, i32) {
    %c0_i32 = arith.constant 0 : i32
    %c0_i32_0 = arith.constant 0 : i32
    %c0_i32_1 = arith.constant 0 : i32
    return %c0_i32, %c0_i32_0 : i32, i32
  }
  func.func @transform_3(%arg0: i32) -> (i32, i32) {
    %c0_i32 = arith.constant 0 : i32
    %c0_i32_0 = arith.constant 0 : i32
    %c0_i32_1 = arith.constant 0 : i32
    return %c0_i32, %c0_i32_0 : i32, i32
  }
  func.func @transform_4(%arg0: i32) -> (i32, i32) {
    %c0_i32 = arith.constant 0 : i32
    %c0_i32_0 = arith.constant 0 : i32
    return %arg0, %c0_i32 : i32, i32
  }
  func.func @transform_5(%arg0: i32) -> (i32, i32) {
    %c0_i32 = arith.constant 0 : i32
    %c0_i32_0 = arith.constant 0 : i32
    return %arg0, %c0_i32 : i32, i32
  }
}

</mosaic_0001>

<bundles_post_ra>
// kernel: tpu_custom_call.1
= control target key start
LH: loop header
LB: loop body
LE: loop exit
PB: predicated region body
PF: predicated region fallthrough
CT: control target
= control target key end

     0   :  { %11 = vsyncpa [#allocation3], 0  ;;  %s576_s0 = inlined_call_operand.hbm [shape: f32[128,128], index: 0, kind: input, shape index: {}]   ;;  %s577_s1 = inlined_call_operand.hbm [shape: f32[128,128], index: 1, kind: input, shape index: {}]   ;;  %s578_s2 = inlined_call_operand.hbm [shape: f32[128,128], index: 2, kind: input, shape index: {}]   ;;  %s579_s3 = inlined_call_operand.vmem [shape: f32[1,128], index: 3, kind: input, shape index: {}]   ;;  %s580_s4 = inlined_call_operand.hbm [shape: f32[128,128], index: 4, kind: output, shape index: {0}]   ;;  %s581_s5 = inlined_call_operand.hbm [shape: f32[128,128], index: 5, kind: output, shape index: {1}]  }
   0x1   :  { %12 = vsyncpa [#allocation6], 0 }
   0x2   :  { %13 = vsyncpa [#allocation4], 0 }
   0x3   :  { %14 = vsyncpa [#allocation10], 0  ;;  %s32_s20 = sshll.u32 %s577_s1, 4  ;;  %s488_s21 = smov [#allocation5]   ;;  %s33_s20 = int_to_ptr.hbm [resolvable:$true] %s32_s20 }
   0x4   :  { %s34_s22 = sshll.u32 %s488_s21, 4  ;;  %s19_s25 = sshll.u32 %s576_s0, 4  ;;  %s35_s22 = int_to_ptr.vmem [resolvable:$true] %s34_s22  ;;  %s20_s25 = int_to_ptr.hbm [resolvable:$true] %s19_s25 }
   0x5   :  { %s489_s26 = smov 128   ;;  %s490_s27 = smov 8  }
   0x6   :  { %40 = dma.hbm_to_vmem [thread:$0]  %s33_s20, 2048, %s35_s22, [#allocation6], %s489_s26, %s489_s26, %s490_s27  }
   0x7   :  { %s491_s28 = smov [#allocation2]   ;;  %s45_s1 = sshll.u32 %s578_s2, 4  ;;  %s46_s1 = int_to_ptr.hbm [resolvable:$true] %s45_s1 }
   0x8   :  { %s21_s29 = sshll.u32 %s491_s28, 4  ;;  %s492_s0 = smov [#allocation7]   ;;  %s22_s29 = int_to_ptr.vmem [resolvable:$true] %s21_s29 }
   0x9   :  { %27 = dma.hbm_to_vmem [thread:$0]  %s20_s25, 2048, %s22_s29, [#allocation3], %s489_s26, %s489_s26, %s490_s27  }
   0xa   :  { %s47_s7 = sshll.u32 %s492_s0, 4  ;;  %s48_s7 = int_to_ptr.vmem [resolvable:$true] %s47_s7 }
   0xb   :  { %53 = dma.hbm_to_vmem [thread:$0]  %s46_s1, 2048, %s48_s7, [#allocation6], %s489_s26, %s489_s26, %s490_s27  }
   0xc   :  { %480 = dma.done.wait [#allocation3], 2048  }
   0xd   :  { %481 = vsyncadd [#allocation3], 4294965248 }
   0xe   :  { %482 = dma.done.wait [#allocation6], 4096  }
   0xf   :  { %483 = vsyncadd [#allocation6], 4294963200  ;;  %v99_v0 = vld [vmem:[#allocation5 + $0x78] sm:$0xff]  ;;  %v98_v1 = vld [vmem:[#allocation5 + $0x70] sm:$0xff]  ;;  %s301_s12 = sshll.u32 %s581_s5, 4  ;;  %s494_s13 = smov [#allocation8]   ;;  %s302_s12 = int_to_ptr.hbm [resolvable:$true] %s301_s12 }
  0x10   :  { %v200_v2 = vld [vmem:[#allocation7 + $0x78] sm:$0xff]  ;;  %320 = vmatpush.msra.mxu2 %v99_v0  ;;  %v199_v3 = vld [vmem:[#allocation7 + $0x70] sm:$0xff]  ;;  %v97_v4 = vld [vmem:[#allocation5 + $0x68] sm:$0xff]  ;;  %104 = vmatpush.msra.mxu0 %v99_v0  ;;  %s286_s14 = sshll.u32 %s494_s13, 4  ;;  %s288_s17 = sshll.u32 %s580_s4, 4  ;;  %s287_s14 = int_to_ptr.vmem [resolvable:$true] %s286_s14  ;;  %s289_s17 = int_to_ptr.hbm [resolvable:$true] %s288_s17 }
  0x11   :  { %336 = vmatpush.msra.mxu3 %v200_v2  ;;  %v198_v5 = vld [vmem:[#allocation7 + $0x68] sm:$0xff]  ;;  %201 = vmatpush.msra.mxu1 %v200_v2  ;;  %v96_v6 = vld [vmem:[#allocation5 + $0x60] sm:$0xff]  ;;  %v95_v8 = vld [vmem:[#allocation5 + $0x58] sm:$0xff] }
  0x12   :  { %321 = vmatpush.msra.mxu2 %v98_v1  ;;  %105 = vmatpush.msra.mxu0 %v98_v1  ;;  %v197_v7 = vld [vmem:[#allocation7 + $0x60] sm:$0xff]  ;;  %v196_v9 = vld [vmem:[#allocation7 + $0x58] sm:$0xff]  ;;  %v94_v10 = vld [vmem:[#allocation5 + $0x50] sm:$0xff] }
  0x13   :  { %337 = vmatpush.msra.mxu3 %v199_v3  ;;  %202 = vmatpush.msra.mxu1 %v199_v3  ;;  %v195_v11 = vld [vmem:[#allocation7 + $0x50] sm:$0xff]  ;;  %v93_v12 = vld [vmem:[#allocation5 + $0x48] sm:$0xff]  ;;  %v92_v14 = vld [vmem:[#allocation5 + $0x40] sm:$0xff] }
  0x14   :  { %322 = vmatpush.msra.mxu2 %v97_v4  ;;  %106 = vmatpush.msra.mxu0 %v97_v4  ;;  %v194_v13 = vld [vmem:[#allocation7 + $0x48] sm:$0xff]  ;;  %v193_v15 = vld [vmem:[#allocation7 + $0x40] sm:$0xff]  ;;  %v91_v16 = vld [vmem:[#allocation5 + $0x38] sm:$0xff] }
  0x15   :  { %338 = vmatpush.msra.mxu3 %v198_v5  ;;  %203 = vmatpush.msra.mxu1 %v198_v5  ;;  %v192_v17 = vld [vmem:[#allocation7 + $0x38] sm:$0xff]  ;;  %v90_v18 = vld [vmem:[#allocation5 + $0x30] sm:$0xff]  ;;  %v89_v20 = vld [vmem:[#allocation5 + $0x28] sm:$0xff] }
  0x16   :  { %323 = vmatpush.msra.mxu2 %v96_v6  ;;  %107 = vmatpush.msra.mxu0 %v96_v6  ;;  %v191_v19 = vld [vmem:[#allocation7 + $0x30] sm:$0xff]  ;;  %v190_v21 = vld [vmem:[#allocation7 + $0x28] sm:$0xff]  ;;  %v88_v22 = vld [vmem:[#allocation5 + $0x20] sm:$0xff] }
  0x17   :  { %339 = vmatpush.msra.mxu3 %v197_v7  ;;  %204 = vmatpush.msra.mxu1 %v197_v7  ;;  %v189_v23 = vld [vmem:[#allocation7 + $0x20] sm:$0xff]  ;;  %v87_v24 = vld [vmem:[#allocation5 + $0x18] sm:$0xff]  ;;  %v86_v26 = vld [vmem:[#allocation5 + $0x10] sm:$0xff] }
  0x18   :  { %324 = vmatpush.msra.mxu2 %v95_v8  ;;  %108 = vmatpush.msra.mxu0 %v95_v8  ;;  %v188_v25 = vld [vmem:[#allocation7 + $0x18] sm:$0xff]  ;;  %v187_v27 = vld [vmem:[#allocation7 + $0x10] sm:$0xff]  ;;  %v85_v28 = vld [vmem:[#allocation5 + $0x8] sm:$0xff] }
  0x19   :  { %340 = vmatpush.msra.mxu3 %v196_v9  ;;  %205 = vmatpush.msra.mxu1 %v196_v9  ;;  %v186_v29 = vld [vmem:[#allocation7 + $0x8] sm:$0xff]  ;;  %v84_v30 = vld [vmem:[#allocation5] sm:$0xff]  ;;  %v78_v36 = vld [vmem:[#allocation2 + $0x50] sm:$0xff] }
  0x1a   :  { %325 = vmatpush.msra.mxu2 %v94_v10  ;;  %109 = vmatpush.msra.mxu0 %v94_v10  ;;  %v185_v31 = vld [vmem:[#allocation7] sm:$0xff]  ;;  %v77_v34 = vld [vmem:[#allocation2 + $0x48] sm:$0xff]  ;;  %v70_v37 = vld [vmem:[#allocation2 + $0x10] sm:$0xff] }
  0x1b   :  { %341 = vmatpush.msra.mxu3 %v195_v11  ;;  %206 = vmatpush.msra.mxu1 %v195_v11  ;;  %v76_v32 = vld [vmem:[#allocation2 + $0x40] sm:$0xff]  ;;  %v69_v35 = vld [vmem:[#allocation2 + $0x8] sm:$0xff]  ;;  %v79_v38 = vld [vmem:[#allocation2 + $0x58] sm:$0xff] }
  0x1c   :  { %326 = vmatpush.msra.mxu2 %v93_v12  ;;  %110 = vmatpush.msra.mxu0 %v93_v12  ;;  %v68_v33 = vld [vmem:[#allocation2] sm:$0xff]  ;;  %v71_v39 = vld [vmem:[#allocation2 + $0x18] sm:$0xff]  ;;  %v81_v42 = vld [vmem:[#allocation2 + $0x68] sm:$0xff] }
  0x1d   :  { %342 = vmatpush.msra.mxu3 %v194_v13  ;;  %207 = vmatpush.msra.mxu1 %v194_v13  ;;  %v80_v40 = vld [vmem:[#allocation2 + $0x60] sm:$0xff]  ;;  %v73_v43 = vld [vmem:[#allocation2 + $0x28] sm:$0xff]  ;;  %v82_v44 = vld [vmem:[#allocation2 + $0x70] sm:$0xff] }
  0x1e   :  { %327 = vmatpush.msra.mxu2 %v92_v14  ;;  %111 = vmatpush.msra.mxu0 %v92_v14  ;;  %v72_v41 = vld [vmem:[#allocation2 + $0x20] sm:$0xff]  ;;  %v74_v45 = vld [vmem:[#allocation2 + $0x30] sm:$0xff]  ;;  %v83_v46 = vld [vmem:[#allocation2 + $0x78] sm:$0xff] }
  0x1f   :  { %343 = vmatpush.msra.mxu3 %v193_v15  ;;  %208 = vmatpush.msra.mxu1 %v193_v15  ;;  %v75_v47 = vld [vmem:[#allocation2 + $0x38] sm:$0xff]  ;;  %v546_v48 = vld [vmem:[%s579_s3] ss:$0 sm:$0xff]  ;;  %s493_s3 = smov [#allocation9]  }
  0x20   :  { %328 = vmatpush.msra.mxu2 %v91_v16  ;;  %112 = vmatpush.msra.mxu0 %v91_v16  ;;  %s299_s9 = sshll.u32 %s493_s3, 4  ;;  %s300_s9 = int_to_ptr.vmem [resolvable:$true] %s299_s9 }
  0x21   :  { %344 = vmatpush.msra.mxu3 %v192_v17  ;;  %209 = vmatpush.msra.mxu1 %v192_v17 }
  0x22   :  { %329 = vmatpush.msra.mxu2 %v90_v18  ;;  %113 = vmatpush.msra.mxu0 %v90_v18 }
  0x23   :  { %345 = vmatpush.msra.mxu3 %v191_v19  ;;  %210 = vmatpush.msra.mxu1 %v191_v19 }
  0x24   :  { %330 = vmatpush.msra.mxu2 %v89_v20  ;;  %114 = vmatpush.msra.mxu0 %v89_v20 }
  0x25   :  { %346 = vmatpush.msra.mxu3 %v190_v21  ;;  %211 = vmatpush.msra.mxu1 %v190_v21 }
  0x26   :  { %331 = vmatpush.msra.mxu2 %v88_v22  ;;  %115 = vmatpush.msra.mxu0 %v88_v22 }
  0x27   :  { %347 = vmatpush.msra.mxu3 %v189_v23  ;;  %212 = vmatpush.msra.mxu1 %v189_v23 }
  0x28   :  { %332 = vmatpush.msra.mxu2 %v87_v24  ;;  %116 = vmatpush.msra.mxu0 %v87_v24 }
  0x29   :  { %348 = vmatpush.msra.mxu3 %v188_v25  ;;  %213 = vmatpush.msra.mxu1 %v188_v25 }
  0x2a   :  { %333 = vmatpush.msra.mxu2 %v86_v26  ;;  %117 = vmatpush.msra.mxu0 %v86_v26 }
  0x2b   :  { %349 = vmatpush.msra.mxu3 %v187_v27  ;;  %214 = vmatpush.msra.mxu1 %v187_v27 }
  0x2c   :  { %334 = vmatpush.msra.mxu2 %v85_v28  ;;  %118 = vmatpush.msra.mxu0 %v85_v28 }
  0x2d   :  { %350 = vmatpush.msra.mxu3 %v186_v29  ;;  %215 = vmatpush.msra.mxu1 %v186_v29 }
  0x2e   :  { %335 = vmatpush.msra.mxu2 %v84_v30  ;;  %119 = vmatpush.msra.mxu0 %v84_v30 }
  0x2f   :  { %351 = vmatpush.msra.mxu3 %v185_v31  ;;  %144 = vmatmul.f32.vlgmr.msra.gmra.mxu2 %v76_v32 }
  0x30   :  { %241 = vmatmul.f32.vlgmr.msra.gmra.mxu3 %v76_v32  ;;  %216 = vmatpush.msra.mxu1 %v185_v31 }
  0x31   :  { %120 = vmatmul.f32.vlgmr.msra.gmra.mxu0 %v68_v33  ;;  %217 = vmatmul.f32.vlgmr.msra.gmra.mxu1 %v68_v33 }
  0x37   :  { %147 = vmatmul.f32.gmra.mxu2 %v77_v34 }
  0x38   :  { %244 = vmatmul.f32.gmra.mxu3 %v77_v34 }
  0x39   :  { %123 = vmatmul.f32.gmra.mxu0 %v69_v35  ;;  %220 = vmatmul.f32.gmra.mxu1 %v69_v35 }
  0x3f   :  { %150 = vmatmul.f32.gmra.mxu2 %v78_v36 }
  0x40   :  { %247 = vmatmul.f32.gmra.mxu3 %v78_v36 }
  0x41   :  { %126 = vmatmul.f32.gmra.mxu0 %v70_v37  ;;  %223 = vmatmul.f32.gmra.mxu1 %v70_v37 }
  0x47   :  { %153 = vmatmul.f32.gmra.mxu2 %v79_v38 }
  0x48   :  { %250 = vmatmul.f32.gmra.mxu3 %v79_v38 }
  0x49   :  { %129 = vmatmul.f32.gmra.mxu0 %v71_v39  ;;  %226 = vmatmul.f32.gmra.mxu1 %v71_v39 }
  0x4f   :  { %156 = vmatmul.f32.gmra.mxu2 %v80_v40 }
  0x50   :  { %253 = vmatmul.f32.gmra.mxu3 %v80_v40 }
  0x51   :  { %132 = vmatmul.f32.gmra.mxu0 %v72_v41  ;;  %229 = vmatmul.f32.gmra.mxu1 %v72_v41 }
  0x57   :  { %159 = vmatmul.f32.gmra.mxu2 %v81_v42 }
  0x58   :  { %256 = vmatmul.f32.gmra.mxu3 %v81_v42 }
  0x59   :  { %135 = vmatmul.f32.gmra.mxu0 %v73_v43  ;;  %232 = vmatmul.f32.gmra.mxu1 %v73_v43 }
  0x5f   :  { %162 = vmatmul.f32.gmra.mxu2 %v82_v44 }
  0x60   :  { %259 = vmatmul.f32.gmra.mxu3 %v82_v44 }
  0x61   :  { %138 = vmatmul.f32.gmra.mxu0 %v74_v45  ;;  %235 = vmatmul.f32.gmra.mxu1 %v74_v45 }
  0x67   :  { %165 = vmatmul.f32.gmra.mxu2 %v83_v46 }
  0x68   :  { %262 = vmatmul.f32.gmra.mxu3 %v83_v46 }
  0x69   :  { %141 = vmatmul.f32.gmra.mxu0 %v75_v47  ;;  %238 = vmatmul.f32.gmra.mxu1 %v75_v47 }
  0xae   :  { %v121_v49 = vpop.f32.mrf.mxu0  ;;  %v218_v50 = vpop.f32.mrf.mxu1 }
  0xaf   :  { %v122_v51 = vadd.f32 %v546_v48, %v121_v49  ;;  %266 = vst [vmem:[#allocation9] sm:$0xff] %v218_v50 }
  0xb1   :  { %169 = vst [vmem:[#allocation8] sm:$0xff] %v122_v51 }
  0xb2   :  { %v145_v52 = vpop.f32.mrf.mxu2 }
  0xb3   :  { %v242_v53 = vpop.f32.mrf.mxu3  ;;  %v146_v54 = vadd.f32 %v546_v48, %v145_v52 }
  0xb4   :  { %274 = vst [vmem:[#allocation9 + $0x40] sm:$0xff] %v242_v53 }
  0xb5   :  { %177 = vst [vmem:[#allocation8 + $0x40] sm:$0xff] %v146_v54 }
  0xb6   :  { %v124_v55 = vpop.f32.mrf.mxu0  ;;  %v221_v56 = vpop.f32.mrf.mxu1 }
  0xb7   :  { %v125_v57 = vadd.f32 %v546_v48, %v124_v55  ;;  %267 = vst [vmem:[#allocation9 + $0x8] sm:$0xff] %v221_v56 }
  0xb9   :  { %170 = vst [vmem:[#allocation8 + $0x8] sm:$0xff] %v125_v57 }
  0xba   :  { %v148_v58 = vpop.f32.mrf.mxu2 }
  0xbb   :  { %v245_v59 = vpop.f32.mrf.mxu3  ;;  %v149_v60 = vadd.f32 %v546_v48, %v148_v58 }
  0xbc   :  { %275 = vst [vmem:[#allocation9 + $0x48] sm:$0xff] %v245_v59 }
  0xbd   :  { %178 = vst [vmem:[#allocation8 + $0x48] sm:$0xff] %v149_v60 }
  0xbe   :  { %v127_v61 = vpop.f32.mrf.mxu0  ;;  %v224_v62 = vpop.f32.mrf.mxu1 }
  0xbf   :  { %v128_v63 = vadd.f32 %v546_v48, %v127_v61  ;;  %268 = vst [vmem:[#allocation9 + $0x10] sm:$0xff] %v224_v62 }
  0xc1   :  { %171 = vst [vmem:[#allocation8 + $0x10] sm:$0xff] %v128_v63 }
  0xc2   :  { %v151_v0 = vpop.f32.mrf.mxu2 }
  0xc3   :  { %v248_v1 = vpop.f32.mrf.mxu3  ;;  %v152_v2 = vadd.f32 %v546_v48, %v151_v0 }
  0xc4   :  { %276 = vst [vmem:[#allocation9 + $0x50] sm:$0xff] %v248_v1 }
  0xc5   :  { %179 = vst [vmem:[#allocation8 + $0x50] sm:$0xff] %v152_v2 }
  0xc6   :  { %v130_v3 = vpop.f32.mrf.mxu0  ;;  %v227_v4 = vpop.f32.mrf.mxu1 }
  0xc7   :  { %v131_v5 = vadd.f32 %v546_v48, %v130_v3  ;;  %269 = vst [vmem:[#allocation9 + $0x18] sm:$0xff] %v227_v4 }
  0xc9   :  { %172 = vst [vmem:[#allocation8 + $0x18] sm:$0xff] %v131_v5 }
  0xca   :  { %v154_v6 = vpop.f32.mrf.mxu2 }
  0xcb   :  { %v251_v7 = vpop.f32.mrf.mxu3  ;;  %v155_v8 = vadd.f32 %v546_v48, %v154_v6 }
  0xcc   :  { %277 = vst [vmem:[#allocation9 + $0x58] sm:$0xff] %v251_v7 }
  0xcd   :  { %180 = vst [vmem:[#allocation8 + $0x58] sm:$0xff] %v155_v8 }
  0xce   :  { %v133_v9 = vpop.f32.mrf.mxu0  ;;  %v230_v10 = vpop.f32.mrf.mxu1 }
  0xcf   :  { %v134_v11 = vadd.f32 %v546_v48, %v133_v9  ;;  %270 = vst [vmem:[#allocation9 + $0x20] sm:$0xff] %v230_v10 }
  0xd1   :  { %173 = vst [vmem:[#allocation8 + $0x20] sm:$0xff] %v134_v11 }
  0xd2   :  { %v157_v12 = vpop.f32.mrf.mxu2 }
  0xd3   :  { %v254_v13 = vpop.f32.mrf.mxu3  ;;  %v158_v14 = vadd.f32 %v546_v48, %v157_v12 }
  0xd4   :  { %278 = vst [vmem:[#allocation9 + $0x60] sm:$0xff] %v254_v13 }
  0xd5   :  { %181 = vst [vmem:[#allocation8 + $0x60] sm:$0xff] %v158_v14 }
  0xd6   :  { %v136_v15 = vpop.f32.mrf.mxu0  ;;  %v233_v16 = vpop.f32.mrf.mxu1 }
  0xd7   :  { %v137_v17 = vadd.f32 %v546_v48, %v136_v15  ;;  %271 = vst [vmem:[#allocation9 + $0x28] sm:$0xff] %v233_v16 }
  0xd9   :  { %174 = vst [vmem:[#allocation8 + $0x28] sm:$0xff] %v137_v17 }
  0xda   :  { %v160_v18 = vpop.f32.mrf.mxu2 }
  0xdb   :  { %v257_v19 = vpop.f32.mrf.mxu3  ;;  %v161_v20 = vadd.f32 %v546_v48, %v160_v18 }
  0xdc   :  { %279 = vst [vmem:[#allocation9 + $0x68] sm:$0xff] %v257_v19 }
  0xdd   :  { %182 = vst [vmem:[#allocation8 + $0x68] sm:$0xff] %v161_v20 }
  0xde   :  { %v139_v21 = vpop.f32.mrf.mxu0  ;;  %v236_v22 = vpop.f32.mrf.mxu1 }
  0xdf   :  { %v140_v23 = vadd.f32 %v546_v48, %v139_v21  ;;  %272 = vst [vmem:[#allocation9 + $0x30] sm:$0xff] %v236_v22 }
  0xe1   :  { %175 = vst [vmem:[#allocation8 + $0x30] sm:$0xff] %v140_v23 }
  0xe2   :  { %v163_v24 = vpop.f32.mrf.mxu2 }
  0xe3   :  { %v260_v25 = vpop.f32.mrf.mxu3  ;;  %v164_v26 = vadd.f32 %v546_v48, %v163_v24 }
  0xe4   :  { %280 = vst [vmem:[#allocation9 + $0x70] sm:$0xff] %v260_v25 }
  0xe5   :  { %183 = vst [vmem:[#allocation8 + $0x70] sm:$0xff] %v164_v26 }
  0xe6   :  { %v142_v27 = vpop.f32.mrf.mxu0  ;;  %v239_v28 = vpop.f32.mrf.mxu1 }
  0xe7   :  { %v143_v29 = vadd.f32 %v546_v48, %v142_v27  ;;  %273 = vst [vmem:[#allocation9 + $0x38] sm:$0xff] %v239_v28 }
  0xe9   :  { %176 = vst [vmem:[#allocation8 + $0x38] sm:$0xff] %v143_v29 }
  0xea   :  { %v166_v30 = vpop.f32.mrf.mxu2 }
  0xeb   :  { %v263_v31 = vpop.f32.mrf.mxu3  ;;  %v167_v32 = vadd.f32 %v546_v48, %v166_v30 }
  0xec   :  { %281 = vst [vmem:[#allocation9 + $0x78] sm:$0xff] %v263_v31 }
  0xed   :  { %307 = dma.vmem_to_hbm [thread:$0]  %s300_s9, 2048, %s302_s12, [#allocation10], %s489_s26, %s489_s26, %s490_s27   ;;  %184 = vst [vmem:[#allocation8 + $0x78] sm:$0xff] %v167_v32 }
  0xee   :  { %294 = dma.vmem_to_hbm [thread:$0]  %s287_s14, 2048, %s289_s17, [#allocation4], %s489_s26, %s489_s26, %s490_s27  }
  0xef   :  { %484 = dma.done.wait [#allocation4], 2048  }
  0xf0   :  { %485 = vsyncadd [#allocation4], 4294965248 }
  0xf1   :  { %486 = dma.done.wait [#allocation10], 2048  }
  0xf2   :  { %487 = vsyncadd [#allocation10], 4294965248 }
  0xf3   :  { %316 = vsyncpa [#allocation3], 1 }
  0xf4   :  { %317 = vsyncpa [#allocation6], 1 }
  0xf5   :  { %318 = vsyncpa [#allocation4], 1 }
  0xf6   :  { %319 = vsyncpa [#allocation10], 1 }

</bundles_post_ra>
